<compile_context>
chip_gen: v6e
topology: v6e:2x2x1
jax: 0.10.0
libtpu: 0.0.40
codegen_flags: <defaults>
</compile_context>

<pallas_src>
import functools

import jax
import jax.numpy as jnp
from jax.experimental import pallas as pl
from jax.experimental.pallas import tpu as pltpu


N_ADAPTERS = 4


# ---------------------------------------------------------------------------
# Kernels
# ---------------------------------------------------------------------------

def _fused_kernel(x_ref, w1p_ref, b1p_ref, w2p_ref, b2s_ref, wfct_ref, bfc_ref,
                  sel_ref, o_ref):
    """Single pass: pool + softmax + packed SE adapters + gate + multiply.

    x_ref / o_ref: (Bt, C, HW) -- free NCHW reshape; HW on lanes, C on sublanes.
    x stays in its native dtype; only the tiny (Bt, C)-sized math runs in f32.
    """
    x = x_ref[...]                                            # (Bt, C, HW), native dtype
    hw = x.shape[2]

    # Global average pool over the spatial (lane) axis; accumulate in f32.
    pooled = jnp.sum(x.astype(jnp.float32), axis=2) * (1.0 / hw)        # (Bt, C)

    # Adapter mixture weights: softmax(fc_1(pooled)).
    logits = jnp.dot(pooled, wfct_ref[...],
                     preferred_element_type=jnp.float32) + bfc_ref[...]  # (Bt, n_ad)
    logits = logits - jnp.max(logits, axis=-1, keepdims=True)
    e = jnp.exp(logits)
    w = e / jnp.sum(e, axis=-1, keepdims=True)                           # (Bt, n_ad)

    # Packed SE adapters: one fc1 matmul over all adapters, per-segment softmax
    # scaling on the VPU (selector matmul avoids lane shuffles), one fc2 matmul.
    h = jnp.dot(pooled, w1p_ref[...],
                preferred_element_type=jnp.float32) + b1p_ref[...]       # (Bt, n_ad*hid)
    h = jnp.maximum(h, 0.0)
    w_seg = jnp.dot(w, sel_ref[...],
                    preferred_element_type=jnp.float32)                  # (Bt, n_ad*hid)
    m = jnp.dot(h * w_seg, w2p_ref[...],
                preferred_element_type=jnp.float32)                      # (Bt, C)
    m = m + jnp.dot(w, b2s_ref[...],
                    preferred_element_type=jnp.float32)                  # weighted fc2 biases

    # Cast the tiny gate (not the big tile) to the input dtype; lane broadcast is cheap.
    gate = jax.nn.sigmoid(m).astype(x.dtype)                             # (Bt, C)
    o_ref[...] = (x * gate[:, :, None]).astype(o_ref.dtype)


def _make_pool_kernel(hw_total):
    """Two-pass path, pass 1: tiled global average pool with masked spatial tail."""

    def pool_kernel(x_ref, pooled_ref, acc_ref):
        j = pl.program_id(1)

        @pl.when(j == 0)
        def _():
            acc_ref[...] = jnp.zeros_like(acc_ref)

        x = x_ref[...]                                        # (1, C, tHW), native dtype
        thw = x.shape[2]
        lane = jax.lax.broadcasted_iota(jnp.int32, x.shape, 2) + j * thw
        xf = jnp.where(lane < hw_total, x.astype(jnp.float32), 0.0)
        acc_ref[...] += jnp.sum(xf, axis=2, keepdims=True)    # (1, C, 1) f32

        @pl.when(j == pl.num_programs(1) - 1)
        def _():
            pooled_ref[...] = acc_ref[...] * (1.0 / hw_total)

    return pool_kernel


def _apply_gate_kernel(x_ref, gate_ref, o_ref):
    """Two-pass path, pass 2: lane-dense gated multiply in the input dtype.

    x_ref: (1, C, tHW); gate_ref: (1, C, 1) already cast to x dtype.
    OOB lanes of a partial tail tile are dropped by Pallas' masked writeback.
    """
    o_ref[...] = (x_ref[...] * gate_ref[...]).astype(o_ref.dtype)


# ---------------------------------------------------------------------------
# Parameter construction / packing
# ---------------------------------------------------------------------------

def init_params(key, planes, reduction=16):
    """Raw per-adapter parameters, matching the PyTorch layer shapes/init."""
    hidden = max(planes // reduction, 1)
    ks = jax.random.split(key, 6)

    def uinit(k, shape, fan_in):
        bound = 1.0 / jnp.sqrt(fan_in)
        return jax.random.uniform(k, shape, jnp.float32, -bound, bound)

    return {
        "w1": uinit(ks[0], (N_ADAPTERS, hidden, planes), planes),   # Linear(planes->hidden).weight
        "b1": uinit(ks[1], (N_ADAPTERS, hidden), planes),
        "w2": uinit(ks[2], (N_ADAPTERS, planes, hidden), hidden),   # Linear(hidden->planes).weight
        "b2": uinit(ks[3], (N_ADAPTERS, planes), hidden),
        "wfc": uinit(ks[4], (N_ADAPTERS, planes), planes),          # Linear(planes->n_ad).weight
        "bfc": uinit(ks[5], (N_ADAPTERS,), planes),
    }


def pack_params(raw):
    """Pack the 4 SE adapters into two dense matrices + a segment-selector matrix."""
    w1, b1, w2, b2 = raw["w1"], raw["b1"], raw["w2"], raw["b2"]
    n_ad, hidden, planes = w1.shape
    nh = n_ad * hidden
    # W1p[:, i*hid+j] = w1[i, j, :]  (column block i == W1_i^T)
    w1p = jnp.transpose(w1, (2, 0, 1)).reshape(planes, nh)
    b1p = b1.reshape(1, nh)
    # W2p[i*hid+j, :] = w2[i, :, j]  (row block i == W2_i^T)
    w2p = jnp.transpose(w2, (0, 2, 1)).reshape(nh, planes)
    # Selector: (w @ sel) repeats each softmax weight `hidden` times.
    sel = jnp.repeat(jnp.eye(n_ad, dtype=jnp.float32), hidden, axis=1)    # (n_ad, nh)
    return {
        "w1p": w1p, "b1p": b1p,
        "w2p": w2p, "b2s": b2,                 # (n_ad, planes): weighted-summed in kernel
        "wfct": raw["wfc"].T,                  # (planes, n_ad)
        "bfc": raw["bfc"].reshape(1, n_ad),
        "sel": sel,
    }


def _gate_from_pooled(pooled, p):
    """Pure-JAX gate precompute (two-pass path) on tiny (B, C) pooled values."""
    hp = jax.lax.Precision.HIGHEST
    logits = jnp.dot(pooled, p["wfct"], precision=hp) + p["bfc"]
    w = jax.nn.softmax(logits, axis=-1)
    h = jax.nn.relu(jnp.dot(pooled, p["w1p"], precision=hp) + p["b1p"])
    w_seg = jnp.dot(w, p["sel"], precision=hp)
    m = jnp.dot(h * w_seg, p["w2p"], precision=hp) + jnp.dot(w, p["b2s"], precision=hp)
    return jax.nn.sigmoid(m)


# ---------------------------------------------------------------------------
# Hardware queries & tile picking
# ---------------------------------------------------------------------------

def _tpu_info():
    try:
        return pltpu.get_tpu_info()
    except Exception:
        return None


def _default_vmem_limit_bytes():
    info = _tpu_info()
    phys = getattr(info, "vmem_capacity_bytes", None) if info is not None else None
    try:
        phys = int(phys) if phys else 0
    except Exception:
        phys = 0
    if phys <= 0:
        phys = 64 * 1024 * 1024          # v7x floor
    return int(min(phys * 3 // 4, 96 * 1024 * 1024))


def _num_tensorcores():
    info = _tpu_info()
    if info is None:
        return 1
    for name in ("num_tensorcores", "num_cores", "tensorcore_count", "cores_per_chip"):
        v = getattr(info, name, None)
        if isinstance(v, int) and v > 0:
            return int(v)
    return 1


def _pick_batch_tile(b, bytes_per_image, cap, n_cores):
    """Largest per-step batch tile that fits `cap`, keeping >= 2 grid steps per
    TensorCore when B allows (megacore sharding + per-core double-buffering);
    on 1-TC chips this degrades to simply 'largest tile with >= 2 steps'."""
    target_steps = min(b, 2 * max(n_cores, 1))
    fitting = [bt for bt in range(1, b + 1)
               if b % bt == 0 and bt * bytes_per_image <= cap]
    if not fitting:
        return 1
    ok = [bt for bt in fitting if b // bt >= target_steps]
    return max(ok) if ok else max(fitting)


def _pick_spatial_tile(hw, row_bytes, cap):
    """Lane tile for the two-pass path: large multiple of 128; tail handled by masking.
    Falls back to the full (layout-legal) extent when HW is small."""
    thw = max((cap // (row_bytes * 128)) * 128, 128)
    if thw >= hw:
        return hw                       # full extent block: always layout-legal, small
    return thw


# ---------------------------------------------------------------------------
# Wrapper
# ---------------------------------------------------------------------------

@functools.partial(jax.jit,
                   static_argnames=("max_tile_bytes", "vmem_limit_bytes", "n_cores"))
def _domain_attention_impl(x_nchw, params, *, max_tile_bytes, vmem_limit_bytes, n_cores):
    b, c, h, w = x_nchw.shape
    hw = h * w
    dtype = x_nchw.dtype
    itemsize = jnp.dtype(dtype).itemsize

    # Free reshape only (no transpose, no extra HBM traffic): HW on lanes, C on sublanes.
    x = x_nchw.reshape(b, c, hw)

    weights = (params["w1p"], params["b1p"], params["w2p"], params["b2s"],
               params["wfct"], params["bfc"], params["sel"])
    weight_bytes = int(sum(int(a.size) * jnp.dtype(a.dtype).itemsize for a in weights))

    def const_spec(a):
        return pl.BlockSpec(a.shape, lambda *idx: (0,) * a.ndim)

    bytes_per_image = hw * c * itemsize

    if bytes_per_image <= max_tile_bytes:
        # ---- fused single pass: pool + softmax + packed SE + gate + multiply ----
        bt = _pick_batch_tile(b, bytes_per_image, max_tile_bytes, n_cores)
        cost = pl.CostEstimate(
            flops=int(3 * b * hw * c),
            transcendentals=int(b * (c + N_ADAPTERS)),
            bytes_accessed=int(2 * b * bytes_per_image + weight_bytes))
        out = pl.pallas_call(
            _fused_kernel,
            out_shape=jax.ShapeDtypeStruct((b, c, hw), dtype),
            grid_spec=pltpu.PrefetchScalarGridSpec(
                num_scalar_prefetch=0,
                grid=(b // bt,),
                in_specs=[pl.BlockSpec((bt, c, hw), lambda i: (i, 0, 0))]
                         + [const_spec(a) for a in weights],
                out_specs=pl.BlockSpec((bt, c, hw), lambda i: (i, 0, 0)),
            ),
            compiler_params=pltpu.CompilerParams(
                dimension_semantics=("parallel",),
                vmem_limit_bytes=vmem_limit_bytes),
            cost_estimate=cost,
        )(x, *weights)
    else:
        # ---- two-pass: Pallas pooling kernel (1 read) -> tiny gate math on (B, C)
        #      -> tiled lane-dense gated multiply (1 read + 1 write) == 3 traversals ----
        thw = _pick_spatial_tile(hw, c * itemsize, max_tile_bytes)
        n_hw = -(-hw // thw)

        pool_cost = pl.CostEstimate(
            flops=int(b * hw * c),
            transcendentals=0,
            bytes_accessed=int(b * bytes_per_image + b * c * 4))
        pooled = pl.pallas_call(
            _make_pool_kernel(hw),
            out_shape=jax.ShapeDtypeStruct((b, c, 1), jnp.float32),
            grid_spec=pltpu.PrefetchScalarGridSpec(
                num_scalar_prefetch=0,
                grid=(b, n_hw),
                in_specs=[pl.BlockSpec((1, c, thw), lambda i, j: (i, 0, j))],
                out_specs=pl.BlockSpec((1, c, 1), lambda i, j: (i, 0, 0)),
                scratch_shapes=[pltpu.VMEM((1, c, 1), jnp.float32)],
            ),
            compiler_params=pltpu.CompilerParams(
                dimension_semantics=("parallel", "arbitrary"),
                vmem_limit_bytes=vmem_limit_bytes),
            cost_estimate=pool_cost,
        )(x)

        gate = _gate_from_pooled(pooled.reshape(b, c), params)       # (B, C) f32
        gate = gate.astype(dtype).reshape(b, c, 1)                   # input dtype for the multiply

        apply_cost = pl.CostEstimate(
            flops=int(b * hw * c),
            transcendentals=0,
            bytes_accessed=int(2 * b * bytes_per_image + b * c * itemsize))
        out = pl.pallas_call(
            _apply_gate_kernel,
            out_shape=jax.ShapeDtypeStruct((b, c, hw), dtype),
            grid_spec=pltpu.PrefetchScalarGridSpec(
                num_scalar_prefetch=0,
                grid=(b, n_hw),
                in_specs=[pl.BlockSpec((1, c, thw), lambda i, j: (i, 0, j)),
                          pl.BlockSpec((1, c, 1), lambda i, j: (i, 0, 0))],
                out_specs=pl.BlockSpec((1, c, thw), lambda i, j: (i, 0, j)),
            ),
            compiler_params=pltpu.CompilerParams(
                dimension_semantics=("parallel", "parallel"),
                vmem_limit_bytes=vmem_limit_bytes),
            cost_estimate=apply_cost,
        )(x, gate)

    return out.reshape(b, c, h, w)


def domain_attention(x_nchw, packed_params, *, max_tile_bytes=None):
    """x_nchw: (B, C, H, W). Returns (B, C, H, W)."""
    vmem_limit = _default_vmem_limit_bytes()
    n_cores = _num_tensorcores()
    if max_tile_bytes is None:
        weight_bytes = sum(int(v.size) * jnp.dtype(v.dtype).itemsize
                           for v in packed_params.values())
        # Per-step footprint ~= double-buffered in + out x blocks (4x tile) + ~1 tile of
        # in-kernel temporaries + double-buffered constant weights + fixed headroom.
        budget = vmem_limit - 2 * weight_bytes - (2 << 20)
        max_tile_bytes = max(budget // 6, 1 << 20)
    return _domain_attention_impl(x_nchw, packed_params,
                                  max_tile_bytes=int(max_tile_bytes),
                                  vmem_limit_bytes=int(vmem_limit),
                                  n_cores=int(n_cores))


# ---------------------------------------------------------------------------
# Pure-JAX reference (mirrors the PyTorch forward, uses the *raw* per-adapter params)
# ---------------------------------------------------------------------------

def reference(x_nchw, raw):
    hp = jax.lax.Precision.HIGHEST
    b, c, h, w = x_nchw.shape
    pooled = jnp.mean(x_nchw.astype(jnp.float32), axis=(2, 3))          # (b, c)
    logits = jnp.dot(pooled, raw["wfc"].T, precision=hp) + raw["bfc"]   # (b, n_ad)
    wsm = jax.nn.softmax(logits, axis=1)
    ys = []
    for i in range(N_ADAPTERS):
        hdn = jax.nn.relu(jnp.dot(pooled, raw["w1"][i].T, precision=hp) + raw["b1"][i])
        ys.append(jnp.dot(hdn, raw["w2"][i].T, precision=hp) + raw["b2"][i])
    se = jnp.stack(ys, axis=2)                                          # (b, c, n_ad)
    m = jnp.einsum("bcn,bn->bc", se, wsm, precision=hp)
    gate = jax.nn.sigmoid(m)[:, :, None, None]
    return x_nchw * gate.astype(x_nchw.dtype)


# ---------------------------------------------------------------------------
# Demo / self-check
# ---------------------------------------------------------------------------

if __name__ == "__main__":
    # planes=128, reduction=16 -> hidden=8; C=128 keeps the packed-SE matmuls tidy.
    B, C, H, W = 4, 128, 8, 8
    key = jax.random.PRNGKey(0)
    kx, kp = jax.random.split(key)
    x = jax.random.normal(kx, (B, C, H, W), jnp.float32)
    raw = init_params(kp, C, reduction=16)
    packed = pack_params(raw)

    ref = reference(x, raw)

    # 1) Fused single-pass path (default tile budget).
    out = jax.block_until_ready(domain_attention(x, packed))
    assert out.shape == (B, C, H, W)
    err = float(jnp.max(jnp.abs(out - ref)))
    # Tolerance allows f32 reassociation (packed-SE matmul grouping vs per-adapter ref).
    assert jnp.allclose(out, ref, atol=1e-4, rtol=1e-4), f"fused path max abs diff {err}"

    # 2) Two-pass path (Pallas pool kernel + gated multiply), forced with a tiny tile cap.
    out2 = jax.block_until_ready(domain_attention(x, packed, max_tile_bytes=16 * 1024))
    err2 = float(jnp.max(jnp.abs(out2 - ref)))
    assert jnp.allclose(out2, ref, atol=1e-4, rtol=1e-4), f"two-pass path max abs diff {err2}"

    # 3) Two-pass path with a non-divisible spatial extent (HW=169 -> 128-lane tile + masked tail).
    H3 = W3 = 13
    x3 = jax.random.normal(jax.random.PRNGKey(1), (B, C, H3, W3), jnp.float32)
    ref3 = reference(x3, raw)
    out3 = jax.block_until_ready(domain_attention(x3, packed, max_tile_bytes=32 * 1024))
    err3 = float(jnp.max(jnp.abs(out3 - ref3)))
    assert jnp.allclose(out3, ref3, atol=1e-4, rtol=1e-4), f"tail path max abs diff {err3}"

    print("KERNEL_OK")
</pallas_src>

<mosaic_0001>
module attributes {stable_mosaic.version = 11 : i64} {
  func.func @_fused_kernel(%arg0: i32, %arg1: memref<2x128x64xf32, #tpu.memory_space<vmem>>, %arg2: memref<128x32xf32, #tpu.memory_space<vmem>>, %arg3: memref<1x32xf32, #tpu.memory_space<vmem>>, %arg4: memref<32x128xf32, #tpu.memory_space<vmem>>, %arg5: memref<4x128xf32, #tpu.memory_space<vmem>>, %arg6: memref<128x4xf32, #tpu.memory_space<vmem>>, %arg7: memref<1x4xf32, #tpu.memory_space<vmem>>, %arg8: memref<4x32xf32, #tpu.memory_space<vmem>>, %arg9: memref<2x128x64xf32, #tpu.memory_space<vmem>>) attributes {dimension_semantics = [#tpu.dimension_semantics<parallel>], iteration_bounds = array<i64: 2>, scalar_prefetch = 0 : i64, scratch_operands = 0 : i64, tpu.core_type = #tpu.core_type<tc>, window_params = [{transform_indices = @transform_0, window_bounds = array<i64: 2, 128, 64>}, {pipeline_mode = #tpu.pipeline_mode<synchronous>, transform_indices = @transform_1, window_bounds = array<i64: 128, 32>}, {pipeline_mode = #tpu.pipeline_mode<synchronous>, transform_indices = @transform_2, window_bounds = array<i64: 1, 32>}, {pipeline_mode = #tpu.pipeline_mode<synchronous>, transform_indices = @transform_3, window_bounds = array<i64: 32, 128>}, {pipeline_mode = #tpu.pipeline_mode<synchronous>, transform_indices = @transform_4, window_bounds = array<i64: 4, 128>}, {pipeline_mode = #tpu.pipeline_mode<synchronous>, transform_indices = @transform_5, window_bounds = array<i64: 128, 4>}, {pipeline_mode = #tpu.pipeline_mode<synchronous>, transform_indices = @transform_6, window_bounds = array<i64: 1, 4>}, {pipeline_mode = #tpu.pipeline_mode<synchronous>, transform_indices = @transform_7, window_bounds = array<i64: 4, 32>}, {transform_indices = @transform_8, window_bounds = array<i64: 2, 128, 64>}]} {
    %c0 = arith.constant 0 : index
    %c0_0 = arith.constant 0 : index
    %c0_1 = arith.constant 0 : index
    %0 = vector.load %arg1[%c0, %c0_0, %c0_1] : memref<2x128x64xf32, #tpu.memory_space<vmem>>, vector<2x128x64xf32>
    %cst = arith.constant dense<0.000000e+00> : vector<2x128xf32>
    %1 = vector.multi_reduction <add>, %0, %cst [2] : vector<2x128x64xf32> to vector<2x128xf32>
    %cst_2 = arith.constant 1.562500e-02 : f32
    %2 = vector.broadcast %cst_2 : f32 to vector<2x128xf32>
    %3 = arith.mulf %1, %2 : vector<2x128xf32>
    %c0_3 = arith.constant 0 : index
    %c0_4 = arith.constant 0 : index
    %4 = vector.load %arg6[%c0_3, %c0_4] : memref<128x4xf32, #tpu.memory_space<vmem>>, vector<128x4xf32>
    %cst_5 = arith.constant dense<0.000000e+00> : vector<2x4xf32>
    %5 = tpu.matmul %3, %4, %cst_5 {dimension_numbers = #tpu.dot_dimension_numbers<[1], [0], [0], [1], [0, 0, 1, 1], [], []>} : vector<2x128xf32>, vector<128x4xf32>, vector<2x4xf32> -> vector<2x4xf32>
    %c0_6 = arith.constant 0 : index
    %c0_7 = arith.constant 0 : index
    %6 = vector.load %arg7[%c0_6, %c0_7] : memref<1x4xf32, #tpu.memory_space<vmem>>, vector<1x4xf32>
    %7 = vector.broadcast %6 : vector<1x4xf32> to vector<2x4xf32>
    %8 = arith.addf %5, %7 : vector<2x4xf32>
    %cst_8 = arith.constant dense<0xFF800000> : vector<2xf32>
    %9 = vector.multi_reduction <maximumf>, %8, %cst_8 [1] : vector<2x4xf32> to vector<2xf32>
    %10 = vector.shape_cast %9 : vector<2xf32> to vector<2x1xf32>
    %11 = vector.broadcast %10 : vector<2x1xf32> to vector<2x4xf32>
    %12 = arith.subf %8, %11 : vector<2x4xf32>
    %13 = math.exp %12 : vector<2x4xf32>
    %cst_9 = arith.constant dense<0.000000e+00> : vector<2xf32>
    %14 = vector.multi_reduction <add>, %13, %cst_9 [1] : vector<2x4xf32> to vector<2xf32>
    %15 = vector.shape_cast %14 : vector<2xf32> to vector<2x1xf32>
    %16 = vector.broadcast %15 : vector<2x1xf32> to vector<2x4xf32>
    %17 = arith.divf %13, %16 : vector<2x4xf32>
    %c0_10 = arith.constant 0 : index
    %c0_11 = arith.constant 0 : index
    %18 = vector.load %arg2[%c0_10, %c0_11] : memref<128x32xf32, #tpu.memory_space<vmem>>, vector<128x32xf32>
    %cst_12 = arith.constant dense<0.000000e+00> : vector<2x32xf32>
    %19 = tpu.matmul %3, %18, %cst_12 {dimension_numbers = #tpu.dot_dimension_numbers<[1], [0], [0], [1], [0, 0, 1, 1], [], []>} : vector<2x128xf32>, vector<128x32xf32>, vector<2x32xf32> -> vector<2x32xf32>
    %c0_13 = arith.constant 0 : index
    %c0_14 = arith.constant 0 : index
    %20 = vector.load %arg3[%c0_13, %c0_14] : memref<1x32xf32, #tpu.memory_space<vmem>>, vector<1x32xf32>
    %21 = vector.broadcast %20 : vector<1x32xf32> to vector<2x32xf32>
    %22 = arith.addf %19, %21 : vector<2x32xf32>
    %cst_15 = arith.constant 0.000000e+00 : f32
    %23 = vector.broadcast %cst_15 : f32 to vector<2x32xf32>
    %24 = arith.maximumf %22, %23 : vector<2x32xf32>
    %c0_16 = arith.constant 0 : index
    %c0_17 = arith.constant 0 : index
    %25 = vector.load %arg8[%c0_16, %c0_17] : memref<4x32xf32, #tpu.memory_space<vmem>>, vector<4x32xf32>
    %cst_18 = arith.constant dense<0.000000e+00> : vector<2x32xf32>
    %26 = tpu.matmul %17, %25, %cst_18 {dimension_numbers = #tpu.dot_dimension_numbers<[1], [0], [0], [1], [0, 0, 1, 1], [], []>} : vector<2x4xf32>, vector<4x32xf32>, vector<2x32xf32> -> vector<2x32xf32>
    %27 = arith.mulf %24, %26 : vector<2x32xf32>
    %c0_19 = arith.constant 0 : index
    %c0_20 = arith.constant 0 : index
    %28 = vector.load %arg4[%c0_19, %c0_20] : memref<32x128xf32, #tpu.memory_space<vmem>>, vector<32x128xf32>
    %cst_21 = arith.constant dense<0.000000e+00> : vector<2x128xf32>
    %29 = tpu.matmul %27, %28, %cst_21 {dimension_numbers = #tpu.dot_dimension_numbers<[1], [0], [0], [1], [0, 0, 1, 1], [], []>} : vector<2x32xf32>, vector<32x128xf32>, vector<2x128xf32> -> vector<2x128xf32>
    %c0_22 = arith.constant 0 : index
    %c0_23 = arith.constant 0 : index
    %30 = vector.load %arg5[%c0_22, %c0_23] : memref<4x128xf32, #tpu.memory_space<vmem>>, vector<4x128xf32>
    %cst_24 = arith.constant dense<0.000000e+00> : vector<2x128xf32>
    %31 = tpu.matmul %17, %30, %cst_24 {dimension_numbers = #tpu.dot_dimension_numbers<[1], [0], [0], [1], [0, 0, 1, 1], [], []>} : vector<2x4xf32>, vector<4x128xf32>, vector<2x128xf32> -> vector<2x128xf32>
    %32 = arith.addf %29, %31 : vector<2x128xf32>
    %33 = arith.negf %32 : vector<2x128xf32>
    %34 = math.exp %33 : vector<2x128xf32>
    %cst_25 = arith.constant 1.000000e+00 : f32
    %35 = vector.broadcast %cst_25 : f32 to vector<2x128xf32>
    %36 = arith.addf %35, %34 : vector<2x128xf32>
    %37 = arith.divf %35, %36 : vector<2x128xf32>
    %38 = vector.shape_cast %37 : vector<2x128xf32> to vector<2x128x1xf32>
    %39 = vector.broadcast %38 : vector<2x128x1xf32> to vector<2x128x64xf32>
    %40 = arith.mulf %0, %39 : vector<2x128x64xf32>
    %c0_26 = arith.constant 0 : index
    %c0_27 = arith.constant 0 : index
    %c0_28 = arith.constant 0 : index
    %41 = vector.load %arg9[%c0_26, %c0_27, %c0_28] : memref<2x128x64xf32, #tpu.memory_space<vmem>>, vector<2x128x64xf32>
    tpu.vector_store %arg9[%c0_26, %c0_27, %c0_28], %40 {strides = array<i32>} : memref<2x128x64xf32, #tpu.memory_space<vmem>>, vector<2x128x64xf32>,
    return
  }
  func.func @transform_0(%arg0: i32) -> (i32, i32, i32) {
    %c0_i32 = arith.constant 0 : i32
    %c0_i32_0 = arith.constant 0 : i32
    %c0_i32_1 = arith.constant 0 : i32
    return %arg0, %c0_i32, %c0_i32_0 : i32, i32, i32
  }
  func.func @transform_1(%arg0: i32) -> (i32, i32) {
    %c0_i32 = arith.constant 0 : i32
    %c0_i32_0 = arith.constant 0 : i32
    %c0_i32_1 = arith.constant 0 : i32
    return %c0_i32, %c0_i32_0 : i32, i32
  }
  func.func @transform_2(%arg0: i32) -> (i32, i32) {
    %c0_i32 = arith.constant 0 : i32
    %c0_i32_0 = arith.constant 0 : i32
    %c0_i32_1 = arith.constant 0 : i32
    return %c0_i32, %c0_i32_0 : i32, i32
  }
  func.func @transform_3(%arg0: i32) -> (i32, i32) {
    %c0_i32 = arith.constant 0 : i32
    %c0_i32_0 = arith.constant 0 : i32
    %c0_i32_1 = arith.constant 0 : i32
    return %c0_i32, %c0_i32_0 : i32, i32
  }
  func.func @transform_4(%arg0: i32) -> (i32, i32) {
    %c0_i32 = arith.constant 0 : i32
    %c0_i32_0 = arith.constant 0 : i32
    %c0_i32_1 = arith.constant 0 : i32
    return %c0_i32, %c0_i32_0 : i32, i32
  }
  func.func @transform_5(%arg0: i32) -> (i32, i32) {
    %c0_i32 = arith.constant 0 : i32
    %c0_i32_0 = arith.constant 0 : i32
    %c0_i32_1 = arith.constant 0 : i32
    return %c0_i32, %c0_i32_0 : i32, i32
  }
  func.func @transform_6(%arg0: i32) -> (i32, i32) {
    %c0_i32 = arith.constant 0 : i32
    %c0_i32_0 = arith.constant 0 : i32
    %c0_i32_1 = arith.constant 0 : i32
    return %c0_i32, %c0_i32_0 : i32, i32
  }
  func.func @transform_7(%arg0: i32) -> (i32, i32) {
    %c0_i32 = arith.constant 0 : i32
    %c0_i32_0 = arith.constant 0 : i32
    %c0_i32_1 = arith.constant 0 : i32
    return %c0_i32, %c0_i32_0 : i32, i32
  }
  func.func @transform_8(%arg0: i32) -> (i32, i32, i32) {
    %c0_i32 = arith.constant 0 : i32
    %c0_i32_0 = arith.constant 0 : i32
    %c0_i32_1 = arith.constant 0 : i32
    return %arg0, %c0_i32, %c0_i32_0 : i32, i32, i32
  }
}

</mosaic_0001>

<bundles_post_ra>
// kernel: _domain_attention_impl.1
= control target key start
LH: loop header
LB: loop body
LE: loop exit
PB: predicated region body
PF: predicated region fallthrough
CT: control target
= control target key end

     0   :  { %s1628_s27 = smov 0   ;;  %s2191_s0 = inlined_call_operand.vmem [shape: f32[4,128,64], index: 0, kind: input, shape index: {}]   ;;  %s2192_s1 = inlined_call_operand.vmem [shape: f32[128,32], index: 1, kind: input, shape index: {}]   ;;  %s2193_s2 = inlined_call_operand.vmem [shape: f32[1,32], index: 2, kind: input, shape index: {}]   ;;  %s2194_s3 = inlined_call_operand.vmem [shape: f32[32,128], index: 3, kind: input, shape index: {}]   ;;  %s2195_s4 = inlined_call_operand.vmem [shape: f32[4,128], index: 4, kind: input, shape index: {}]   ;;  %s2196_s5 = inlined_call_operand.vmem [shape: f32[128,4], index: 5, kind: input, shape index: {}]   ;;  %s2197_s6 = inlined_call_operand.vmem [shape: f32[1,4], index: 6, kind: input, shape index: {}]   ;;  %s2198_s7 = inlined_call_operand.vmem [shape: f32[4,32], index: 7, kind: input, shape index: {}]   ;;  %s2199_s8 = inlined_call_operand.vmem [shape: f32[4,128,64], index: 8, kind: output, shape index: {}]  }
   0x1 LB: > { %s1393_s28 = sadd.s32 4294967295, %s1579_s27   ;;  %p1397_p0 = scmp.ge.s32.totalorder %s1579_s27, 1  ;;  %s1579_s27 = sphi %s1628_s27, %s18_s27  }
   0x2   : > { %p264_p1 = scmp.lt.s32.totalorder %s1579_s27, 3 }
   0x4   : > { %p265_p2 = pnand %p1397_p0, %p264_p1 }
   0x6   : > { %268 = sbr.rel (%p265_p2) target bundleno = 1337 (0x539), region = 52 }
   0xb   : > { %s1398_s29 = sshll.u32 %s1393_s28, 1  ;;  %vm346_vm0 = vcmask 523264   ;;  %v490_v50 = vld [vmem:[%s2196_s5 + $0x78] sm:$0xff]  ;;  %v2200_v55 = vmov 0.0   ;;  %v489_v57 = vld [vmem:[%s2196_s5 + $0x70] sm:$0xff]  ;;  %v488_v59 = vld [vmem:[%s2196_s5 + $0x68] sm:$0xff] }
   0xc   : > { %p301_p3 = scmp.lt.s32.totalorder %s1398_s29, 3  ;;  %v820_v51 = vld [vmem:[%s2192_s1 + $0x78] sm:$0xff]  ;;  %1459 = vmatprep.subr.mxu0 %v2200_v55  ;;  %1494 = vmatprep.subr.mxu1 %v2200_v55  ;;  %v819_v58 = vld [vmem:[%s2192_s1 + $0x70] sm:$0xff]  ;;  %v818_v60 = vld [vmem:[%s2192_s1 + $0x68] sm:$0xff]  ;;  %vm1582_vm1 = vmmov 0   ;;  %vm541_vm2 = vcmask 130112  }
   0xd   : > { %1460 = vmatpush3.msra.mxu0 %v490_v50  ;;  %1495 = vmatpush3.msra.mxu1 %v820_v51  ;;  %v476_v50 = vld [vmem:[%s2196_s5 + $0x8] sm:$0xff]  ;;  %vm548_vm3 = vcmask 195712   ;;  %vm555_vm4 = vcmask 261312   ;;  %vm562_vm5 = vcmask 326912   ;;  %vm569_vm6 = vcmask 392512  }
   0xe   : > { %s2255_s29 = smov (!%p301_p3, %s1398_s29), 3  ;;  %1461 = vmatprep.subr.mxu0 %v2200_v55  ;;  %1496 = vmatprep.subr.mxu1 %v2200_v55  ;;  %v806_v51 = vld [vmem:[%s2192_s1 + $0x8] sm:$0xff]  ;;  %vm576_vm7 = vcmask 458112   ;;  %vm583_vm8 = vcmask 523712   ;;  %vm590_vm9 = vcmask 589312   ;;  %vm597_vm10 = vcmask 654912  }
   0xf   : > { %s1414_s30 = sshll.u32 %s2255_s29, 7  ;;  %1462 = vmatpush3.msra.mxu0 %v489_v57  ;;  %1497 = vmatpush3.msra.mxu1 %v819_v58  ;;  %vm604_vm11 = vcmask 720512   ;;  %vm611_vm12 = vcmask 786112   ;;  %vm618_vm13 = vcmask 851712   ;;  %vm625_vm14 = vcmask 917312  }
  0x10   : > { %s1644_s11 = scalar_lea.vmem %s2191_s0, %s1414_s30  ;;  %1463 = vmatprep.subr.mxu0 %v2200_v55  ;;  %1498 = vmatprep.subr.mxu1 %v2200_v55  ;;  %vm632_vm15 = vcmask 982912   ;;  %s2090_s22 = scalar_lea.vmem %s2199_s8, %s1414_s30 }
  0x11   : > { %v330_v0 = vld [vmem:[%s1644_s11 + $0x80] sm:$0xff]  ;;  %v331_v2 = vld [vmem:[%s1644_s11 + $0x88] sm:$0xff]  ;;  %v332_v8 = vld [vmem:[%s1644_s11 + $0x90] sm:$0xff]  ;;  %1464 = vmatpush3.msra.mxu0 %v488_v59  ;;  %1499 = vmatpush3.msra.mxu1 %v818_v60 }
  0x12   : > { %v1648_v1 = vld [vmem:[%s1644_s11] sm:$0xff]  ;;  %v395_v3 = vsel %vm346_vm0, %v330_v0, 0.0  ;;  %v1655_v5 = vld [vmem:[%s1644_s11 + $0x8] sm:$0xff]  ;;  %v398_v6 = vsel %vm346_vm0, %v331_v2, 0.0  ;;  %v1662_v9 = vld [vmem:[%s1644_s11 + $0x10] sm:$0xff]  ;;  %v401_v10 = vsel %vm346_vm0, %v332_v8, 0.0  ;;  %1465 = vmatprep.subr.mxu0 %v2200_v55  ;;  %1500 = vmatprep.subr.mxu1 %v2200_v55 }
  0x13   : > { %v347_v4 = vsel %vm346_vm0, %v1648_v1, 0.0  ;;  %396 = vadd.xlane.f32.xlu1 %v395_v3  ;;  %v350_v7 = vsel %vm346_vm0, %v1655_v5, 0.0  ;;  %v353_v11 = vsel %vm346_vm0, %v1662_v9, 0.0  ;;  %v333_v12 = vld [vmem:[%s1644_s11 + $0x98] sm:$0xff]  ;;  %v1675_v16 = vld [vmem:[%s1644_s11 + $0xa0] sm:$0xff]  ;;  %v335_v20 = vld [vmem:[%s1644_s11 + $0xa8] sm:$0xff]  ;;  %1491 = vmatprep.mubr.msk.f32.mxu0 %vm1582_vm1, %v2200_v55 }
  0x14   : > { %348 = vadd.xlane.f32.xlu0 %v347_v4  ;;  %v1669_v13 = vld [vmem:[%s1644_s11 + $0x18] sm:$0xff]  ;;  %v404_v14 = vsel %vm346_vm0, %v333_v12, 0.0  ;;  %2219 = vst [vmem:[#allocation2_spill] sm:$0xff] %v1675_v16  ;;  %v1678_v17 = vld [vmem:[%s1644_s11 + $0x20] sm:$0xff]  ;;  %v407_v18 = vsel %vm346_vm0, %v1675_v16, 0.0  ;;  %v1686_v21 = vld [vmem:[%s1644_s11 + $0x28] sm:$0xff]  ;;  %1526 = vmatprep.mubr.msk.f32.mxu1 %vm1582_vm1, %v2200_v55 }
  0x15   : > { %v356_v15 = vsel %vm346_vm0, %v1669_v13, 0.0  ;;  %v359_v19 = vsel %vm346_vm0, %v1678_v17, 0.0  ;;  %v410_v22 = vsel %vm346_vm0, %v335_v20, 0.0  ;;  %v362_v23 = vsel %vm346_vm0, %v1686_v21, 0.0  ;;  %v1692_v24 = vld [vmem:[%s1644_s11 + $0xb0] sm:$0xff]  ;;  %v1702_v28 = vld [vmem:[%s1644_s11 + $0xb8] sm:$0xff] }
  0x16   : > { %2220 = vst [vmem:[#allocation3_spill] sm:$0xff] %v1692_v24  ;;  %v1695_v25 = vld [vmem:[%s1644_s11 + $0x30] sm:$0xff]  ;;  %v413_v26 = vsel %vm346_vm0, %v1692_v24, 0.0  ;;  %2221 = vst [vmem:[#allocation4_spill] sm:$0xff] %v1702_v28  ;;  %v1705_v29 = vld [vmem:[%s1644_s11 + $0x38] sm:$0xff]  ;;  %v416_v30 = vsel %vm346_vm0, %v1702_v28, 0.0 }
  0x17   : > { %399 = vadd.xlane.f32.xlu1 %v398_v6  ;;  %v365_v27 = vsel %vm346_vm0, %v1695_v25, 0.0  ;;  %v368_v31 = vsel %vm346_vm0, %v1705_v29, 0.0  ;;  %v1712_v32 = vld [vmem:[%s1644_s11 + $0xc0] sm:$0xff]  ;;  %v1722_v36 = vld [vmem:[%s1644_s11 + $0xc8] sm:$0xff]  ;;  %v1732_v40 = vld [vmem:[%s1644_s11 + $0xd0] sm:$0xff] }
  0x18   : > { %351 = vadd.xlane.f32.xlu0 %v350_v7  ;;  %2222 = vst [vmem:[#allocation5_spill] sm:$0xff] %v1712_v32  ;;  %v1715_v33 = vld [vmem:[%s1644_s11 + $0x40] sm:$0xff]  ;;  %v419_v34 = vsel %vm346_vm0, %v1712_v32, 0.0  ;;  %2223 = vst [vmem:[#allocation6_spill] sm:$0xff] %v1722_v36  ;;  %v1725_v37 = vld [vmem:[%s1644_s11 + $0x48] sm:$0xff]  ;;  %v422_v38 = vsel %vm346_vm0, %v1722_v36, 0.0 }
  0x19   : > { %v371_v35 = vsel %vm346_vm0, %v1715_v33, 0.0  ;;  %2224 = vst [vmem:[#allocation7_spill] sm:$0xff] %v1725_v37  ;;  %v374_v39 = vsel %vm346_vm0, %v1725_v37, 0.0  ;;  %2225 = vst [vmem:[#allocation8_spill] sm:$0xff] %v1732_v40  ;;  %v1735_v41 = vld [vmem:[%s1644_s11 + $0x50] sm:$0xff]  ;;  %v425_v42 = vsel %vm346_vm0, %v1732_v40, 0.0 }
  0x1a   : > { %v377_v43 = vsel %vm346_vm0, %v1735_v41, 0.0  ;;  %v1742_v44 = vld [vmem:[%s1644_s11 + $0xd8] sm:$0xff]  ;;  %v1752_v48 = vld [vmem:[%s1644_s11 + $0xe0] sm:$0xff]  ;;  %v1768_v54 = vld [vmem:[%s1644_s11 + $0xe8] sm:$0xff] }
  0x1b   : > { %402 = vadd.xlane.f32.xlu1 %v401_v10  ;;  %2226 = vst [vmem:[#allocation9_spill] sm:$0xff] %v1742_v44  ;;  %v1745_v45 = vld [vmem:[%s1644_s11 + $0x58] sm:$0xff]  ;;  %v428_v46 = vsel %vm346_vm0, %v1742_v44, 0.0  ;;  %2228 = vst [vmem:[#allocation11_spill] sm:$0xff] %v1752_v48  ;;  %v1755_v49 = vld [vmem:[%s1644_s11 + $0x60] sm:$0xff]  ;;  %v431_v52 = vsel %vm346_vm0, %v1752_v48, 0.0 }
  0x1c   : > { %354 = vadd.xlane.f32.xlu0 %v353_v11  ;;  %2227 = vst [vmem:[#allocation10_spill] sm:$0xff] %v1745_v45  ;;  %v380_v47 = vsel %vm346_vm0, %v1745_v45, 0.0  ;;  %2229 = vst [vmem:[#allocation12_spill] sm:$0xff] %v1755_v49  ;;  %v383_v53 = vsel %vm346_vm0, %v1755_v49, 0.0  ;;  %v1773_v56 = vld [vmem:[%s1644_s11 + $0x68] sm:$0xff]  ;;  %v434_v61 = vsel %vm346_vm0, %v1768_v54, 0.0 }
  0x1d   : > { %2230 = vst [vmem:[#allocation13_spill] sm:$0xff] %v1768_v54  ;;  %2231 = vst [vmem:[#allocation14_spill] sm:$0xff] %v1773_v56  ;;  %v386_v62 = vsel %vm346_vm0, %v1773_v56, 0.0  ;;  %v1794_v63 = vld [vmem:[%s1644_s11 + $0xf0] sm:$0xff]  ;;  %v487_v2 = vld [vmem:[%s2196_s5 + $0x60] sm:$0xff] }
  0x1e   : > { %2232 = vst [vmem:[#allocation15_spill] sm:$0xff] %v1794_v63  ;;  %v1797_v0 = vld [vmem:[%s1644_s11 + $0x70] sm:$0xff]  ;;  %v817_v3 = vld [vmem:[%s2192_s1 + $0x60] sm:$0xff]  ;;  %v437_v4 = vsel %vm346_vm0, %v1794_v63, 0.0  ;;  %v1812_v7 = vld [vmem:[%s1644_s11 + $0xf8] sm:$0xff]  ;;  %1466 = vmatpush3.msra.mxu0 %v487_v2 }
  0x1f   : > { %405 = vadd.xlane.f32.xlu1 %v404_v14  ;;  %2233 = vst [vmem:[#allocation16_spill] sm:$0xff] %v1797_v0  ;;  %v389_v6 = vsel %vm346_vm0, %v1797_v0, 0.0  ;;  %2234 = vst [vmem:[#allocation17_spill] sm:$0xff] %v1812_v7  ;;  %v1817_v8 = vld [vmem:[%s1644_s11 + $0x78] sm:$0xff]  ;;  %1501 = vmatpush3.msra.mxu1 %v817_v3  ;;  %v485_v12 = vld [vmem:[%s2196_s5 + $0x50] sm:$0xff] }
  0x20   : > { %357 = vadd.xlane.f32.xlu0 %v356_v15  ;;  %2235 = vst [vmem:[#allocation18_spill] sm:$0xff] %v1817_v8  ;;  %v486_v10 = vld [vmem:[%s2196_s5 + $0x58] sm:$0xff]  ;;  %1467 = vmatprep.subr.mxu0 %v2200_v55  ;;  %v815_v14 = vld [vmem:[%s2192_s1 + $0x50] sm:$0xff]  ;;  %v440_v15 = vsel %vm346_vm0, %v1812_v7, 0.0  ;;  %v814_v20 = vld [vmem:[%s2192_s1 + $0x48] sm:$0xff] }
  0x21   : > { %v816_v11 = vld [vmem:[%s2192_s1 + $0x58] sm:$0xff]  ;;  %1502 = vmatprep.subr.mxu1 %v2200_v55  ;;  %1468 = vmatpush3.msra.mxu0 %v486_v10 }
  0x22   : > { %1503 = vmatpush3.msra.mxu1 %v816_v11  ;;  %1469 = vmatprep.subr.mxu0 %v2200_v55 }
  0x23   : > { %408 = vadd.xlane.f32.xlu1 %v407_v18  ;;  %v392_v18 = vsel %vm346_vm0, %v1817_v8, 0.0  ;;  %1504 = vmatprep.subr.mxu1 %v2200_v55 }
  0x24   : > { %360 = vadd.xlane.f32.xlu0 %v359_v19  ;;  %1470 = vmatpush3.msra.mxu0 %v485_v12  ;;  %v484_v19 = vld [vmem:[%s2196_s5 + $0x48] sm:$0xff] }
  0x25   : > { %1505 = vmatpush3.msra.mxu1 %v815_v14  ;;  %1471 = vmatprep.subr.mxu0 %v2200_v55 }
  0x26   : > { %1506 = vmatprep.subr.mxu1 %v2200_v55  ;;  %1472 = vmatpush3.msra.mxu0 %v484_v19 }
  0x27   : > { %411 = vadd.xlane.f32.xlu1 %v410_v22  ;;  %v483_v22 = vld [vmem:[%s2196_s5 + $0x40] sm:$0xff]  ;;  %1507 = vmatpush3.msra.mxu1 %v814_v20 }
  0x28   : > { %363 = vadd.xlane.f32.xlu0 %v362_v23  ;;  %v813_v23 = vld [vmem:[%s2192_s1 + $0x40] sm:$0xff]  ;;  %1473 = vmatprep.subr.mxu0 %v2200_v55 }
  0x29   : > { %1508 = vmatprep.subr.mxu1 %v2200_v55  ;;  %1474 = vmatpush3.msra.mxu0 %v483_v22 }
  0x2a   : > { %1509 = vmatpush3.msra.mxu1 %v813_v23  ;;  %1475 = vmatprep.subr.mxu0 %v2200_v55 }
  0x2b   : > { %414 = vadd.xlane.f32.xlu1 %v413_v26  ;;  %v482_v26 = vld [vmem:[%s2196_s5 + $0x38] sm:$0xff]  ;;  %1510 = vmatprep.subr.mxu1 %v2200_v55 }
  0x2c   : > { %366 = vadd.xlane.f32.xlu0 %v365_v27  ;;  %v812_v27 = vld [vmem:[%s2192_s1 + $0x38] sm:$0xff]  ;;  %1476 = vmatpush3.msra.mxu0 %v482_v26 }
  0x2d   : > { %1511 = vmatpush3.msra.mxu1 %v812_v27  ;;  %1477 = vmatprep.subr.mxu0 %v2200_v55 }
  0x2e   : > { %1512 = vmatprep.subr.mxu1 %v2200_v55 }
  0x2f   : > { %417 = vadd.xlane.f32.xlu1 %v416_v30  ;;  %v481_v30 = vld [vmem:[%s2196_s5 + $0x30] sm:$0xff] }
  0x30   : > { %369 = vadd.xlane.f32.xlu0 %v368_v31  ;;  %v811_v31 = vld [vmem:[%s2192_s1 + $0x30] sm:$0xff]  ;;  %1478 = vmatpush3.msra.mxu0 %v481_v30 }
  0x31   : > { %1513 = vmatpush3.msra.mxu1 %v811_v31  ;;  %1479 = vmatprep.subr.mxu0 %v2200_v55 }
  0x32   : > { %1514 = vmatprep.subr.mxu1 %v2200_v55 }
  0x33   : > { %420 = vadd.xlane.f32.xlu1 %v419_v34  ;;  %v480_v34 = vld [vmem:[%s2196_s5 + $0x28] sm:$0xff] }
  0x34   : > { %372 = vadd.xlane.f32.xlu0 %v371_v35  ;;  %v810_v35 = vld [vmem:[%s2192_s1 + $0x28] sm:$0xff]  ;;  %1480 = vmatpush3.msra.mxu0 %v480_v34 }
  0x35   : > { %1515 = vmatpush3.msra.mxu1 %v810_v35  ;;  %1481 = vmatprep.subr.mxu0 %v2200_v55 }
  0x36   : > { %1516 = vmatprep.subr.mxu1 %v2200_v55 }
  0x37   : > { %423 = vadd.xlane.f32.xlu1 %v422_v38  ;;  %v479_v38 = vld [vmem:[%s2196_s5 + $0x20] sm:$0xff] }
  0x38   : > { %375 = vadd.xlane.f32.xlu0 %v374_v39  ;;  %v809_v39 = vld [vmem:[%s2192_s1 + $0x20] sm:$0xff]  ;;  %1482 = vmatpush3.msra.mxu0 %v479_v38 }
  0x39   : > { %1517 = vmatpush3.msra.mxu1 %v809_v39  ;;  %1483 = vmatprep.subr.mxu0 %v2200_v55 }
  0x3a   : > { %1518 = vmatprep.subr.mxu1 %v2200_v55 }
  0x3b   : > { %426 = vadd.xlane.f32.xlu1 %v425_v42  ;;  %v478_v42 = vld [vmem:[%s2196_s5 + $0x18] sm:$0xff] }
  0x3c   : > { %378 = vadd.xlane.f32.xlu0 %v377_v43  ;;  %v808_v43 = vld [vmem:[%s2192_s1 + $0x18] sm:$0xff]  ;;  %1484 = vmatpush3.msra.mxu0 %v478_v42 }
  0x3d   : > { %1519 = vmatpush3.msra.mxu1 %v808_v43  ;;  %1485 = vmatprep.subr.mxu0 %v2200_v55 }
  0x3e   : > { %1520 = vmatprep.subr.mxu1 %v2200_v55 }
  0x3f   : > { %429 = vadd.xlane.f32.xlu1 %v428_v46  ;;  %v477_v46 = vld [vmem:[%s2196_s5 + $0x10] sm:$0xff] }
  0x40   : > { %381 = vadd.xlane.f32.xlu0 %v380_v47  ;;  %v807_v47 = vld [vmem:[%s2192_s1 + $0x10] sm:$0xff]  ;;  %1486 = vmatpush3.msra.mxu0 %v477_v46 }
  0x41   : > { %1521 = vmatpush3.msra.mxu1 %v807_v47  ;;  %1487 = vmatprep.subr.mxu0 %v2200_v55 }
  0x42   : > { %1522 = vmatprep.subr.mxu1 %v2200_v55  ;;  %1488 = vmatpush3.msra.mxu0 %v476_v50 }
  0x43   : > { %432 = vadd.xlane.f32.xlu1 %v431_v52  ;;  %v475_v52 = vld [vmem:[%s2196_s5] sm:$0xff]  ;;  %1523 = vmatpush3.msra.mxu1 %v806_v51 }
  0x44   : > { %384 = vadd.xlane.f32.xlu0 %v383_v53  ;;  %v805_v53 = vld [vmem:[%s2192_s1] sm:$0xff]  ;;  %1489 = vmatprep.subr.mxu0 %v2200_v55 }
  0x45   : > { %1524 = vmatprep.subr.mxu1 %v2200_v55  ;;  %1490 = vmatpush3.msra.mxu0 %v475_v52 }
  0x46   : > { %1525 = vmatpush3.msra.mxu1 %v805_v53  ;;  %1539 = vmatprep.subr.mxu0 %v2200_v55 }
  0x47   : > { %435 = vadd.xlane.f32.xlu1 %v434_v61  ;;  %1529 = vmatprep.subr.mxu1 %v2200_v55 }
  0x48   : > { %387 = vadd.xlane.f32.xlu0 %v386_v62 }
  0x4b   : > { %438 = vadd.xlane.f32.xlu1 %v437_v4 }
  0x4c   : > { %390 = vadd.xlane.f32.xlu0 %v389_v6 }
  0x4f   : > { %441 = vadd.xlane.f32.xlu1 %v440_v15  ;;  %v530_v15 = vlaneseq }
  0x50   : > { %393 = vadd.xlane.f32.xlu0 %v392_v18 }
  0x51   : > { %v531_v20 = vand.u32 127, %v530_v15  ;;  %v1933_v22 = vshrl.u32 %v530_v15, 7 }
  0x53   : > { %v536_v23 = vadd.s32 4294967288, %v531_v20  ;;  %v543_v26 = vadd.s32 4294967280, %v531_v20  ;;  %v550_v27 = vadd.s32 4294967272, %v531_v20  ;;  %v557_v34 = vadd.s32 4294967264, %v531_v20 }
  0x54   : > { %v564_v35 = vadd.s32 4294967256, %v531_v20  ;;  %v571_v38 = vadd.s32 4294967248, %v531_v20  ;;  %v578_v39 = vadd.s32 4294967240, %v531_v20  ;;  %v585_v42 = vadd.s32 4294967232, %v531_v20 }
  0x55   : > { %v592_v43 = vadd.s32 4294967224, %v531_v20  ;;  %v534_v46 = vsub.s32 %v531_v20, %v1933_v22  ;;  %v599_v47 = vadd.s32 4294967216, %v531_v20  ;;  %v606_v50 = vadd.s32 4294967208, %v531_v20 }
  0x56   : > { %v539_v51 = vsub.s32 %v536_v23, %v1933_v22  ;;  %v546_v52 = vsub.s32 %v543_v26, %v1933_v22  ;;  %v1943_v53 = vsub.s32 %v550_v27, %v1933_v22  ;;  %v1950_v7 = vsub.s32 %v557_v34, %v1933_v22 }
  0x57   : > { %v1953_v54 = vsub.s32 %v564_v35, %v1933_v22  ;;  %v613_v63 = vadd.s32 4294967200, %v531_v20  ;;  %v620_v44 = vadd.s32 4294967192, %v531_v20  ;;  %v1956_v23 = vsub.s32 %v571_v38, %v1933_v22 }
  0x58   : > { %v1959_v26 = vsub.s32 %v578_v39, %v1933_v22  ;;  %v1962_v27 = vsub.s32 %v585_v42, %v1933_v22  ;;  %v1965_v48 = vsub.s32 %v592_v43, %v1933_v22  ;;  %v1968_v35 = vsub.s32 %v599_v47, %v1933_v22 }
  0x59   : > { %v1971_v40 = vsub.s32 %v606_v50, %v1933_v22  ;;  %v1974_v43 = vsub.s32 %v613_v63, %v1933_v22  ;;  %v627_v50 = vadd.s32 4294967184, %v531_v20  ;;  %v634_v56 = vadd.s32 4294967176, %v531_v20 }
  0x9c   : > { %v397_v57 = vpop.xlane.xlu1 %396 }
  0x9d   : > { %v349_v58 = vpop.xlane.xlu0 %348  ;;  %v459_v38 = vmul.f32 0.015625, %v397_v57 }
  0x9e   : > { %v443_v28 = vmul.f32 0.015625, %v349_v58 }
  0x9f   : > { %v644_v0 = vrot.slane %v459_v38, %v534_v46 }
  0xa0   : > { %v400_v59 = vpop.xlane.xlu1 %399  ;;  %v535_v45 = vrot.slane %v443_v28, %v534_v46  ;;  %v1989_v28 = vsub.s32 %v634_v56, %v1933_v22 }
  0xa1   : > { %v352_v60 = vpop.xlane.xlu0 %351  ;;  %v460_v34 = vmul.f32 0.015625, %v400_v59  ;;  %v1977_v59 = vsub.s32 %v620_v44, %v1933_v22 }
  0xa2   : > { %v444_v36 = vmul.f32 0.015625, %v352_v60 }
  0xa3   : > { %v648_v57 = vrot.slane %v460_v34, %v539_v51 }
  0xa4   : > { %v403_v61 = vpop.xlane.xlu1 %402  ;;  %v540_v58 = vrot.slane %v444_v36, %v539_v51 }
  0xa5   : > { %v355_v62 = vpop.xlane.xlu0 %354  ;;  %v461_v32 = vmul.f32 0.015625, %v403_v61 }
  0xa6   : > { %v445_v39 = vmul.f32 0.015625, %v355_v62 }
  0xa7   : > { %v653_v49 = vrot.slane %v461_v32, %v546_v52  ;;  %v649_v32 = vsel %vm541_vm2, %v648_v57, %v644_v0 }
  0xa8   : > { %v406_v2 = vpop.xlane.xlu1 %405 }
  0xa9   : > { %v358_v3 = vpop.xlane.xlu0 %357  ;;  %v462_v16 = vmul.f32 0.015625, %v406_v2  ;;  %v547_v2 = vrot.slane %v445_v39, %v546_v52 }
  0xaa   : > { %v446_v8 = vmul.f32 0.015625, %v358_v3 }
  0xab   : > { %v658_v63 = vrot.slane %v462_v16, %v1943_v53  ;;  %v542_v16 = vsel %vm541_vm2, %v540_v58, %v535_v45  ;;  %vm639_vm2 = vcmask 1048512  }
  0xac   : > { %v409_v4 = vpop.xlane.xlu1 %408  ;;  %v554_v44 = vrot.slane %v446_v8, %v1943_v53 }
  0xad   : > { %v361_v6 = vpop.xlane.xlu0 %360  ;;  %v463_v60 = vmul.f32 0.015625, %v409_v4 }
  0xae   : > { %v447_v47 = vmul.f32 0.015625, %v361_v6 }
  0xaf   : > { %v663_v20 = vrot.slane %v463_v60, %v1950_v7 }
  0xb0   : > { %v412_v10 = vpop.xlane.xlu1 %411  ;;  %v561_v36 = vrot.slane %v447_v47, %v1950_v7 }
  0xb1   : > { %v364_v11 = vpop.xlane.xlu0 %363  ;;  %v464_v61 = vmul.f32 0.015625, %v412_v10  ;;  %v1986_v10 = vsub.s32 %v627_v50, %v1933_v22 }
  0xb2   : > { %v448_v62 = vmul.f32 0.015625, %v364_v11 }
  0xb3   : > { %v668_v8 = vrot.slane %v464_v61, %v1953_v54 }
  0xb4   : > { %v1925_v12 = vpop.xlane.xlu1 %414  ;;  %v568_v11 = vrot.slane %v448_v62, %v1953_v54 }
  0xb5   : > { %v1927_v14 = vpop.xlane.xlu0 %366  ;;  %v465_v4 = vmul.f32 0.015625, %v1925_v12  ;;  %v654_v12 = vsel %vm548_vm3, %v653_v49, %v649_v32 }
  0xb6   : > { %v449_v6 = vmul.f32 0.015625, %v1927_v14  ;;  %v549_v14 = vsel %vm548_vm3, %v547_v2, %v542_v16  ;;  %v659_v0 = vsel %vm555_vm4, %v658_v63, %v654_v12  ;;  %vm720_vm3 = vcmask 1041409  }
  0xb7   : > { %v556_v45 = vsel %vm555_vm4, %v554_v44, %v549_v14  ;;  %v673_v52 = vrot.slane %v465_v4, %v1956_v23  ;;  %v664_v49 = vsel %vm562_vm5, %v663_v20, %v659_v0  ;;  %vm793_vm4 = vcmask 25600  }
  0xb8   : > { %v1929_v18 = vpop.xlane.xlu1 %417  ;;  %v575_v54 = vrot.slane %v449_v6, %v1956_v23  ;;  %v563_v53 = vsel %vm562_vm5, %v561_v36, %v556_v45  ;;  %v669_v34 = vsel %vm569_vm6, %v668_v8, %v664_v49  ;;  %vm904_vm5 = vcmask 1043456  }
  0xb9   : > { %v1931_v19 = vpop.xlane.xlu0 %369  ;;  %v466_v7 = vmul.f32 0.015625, %v1929_v18  ;;  %v570_v38 = vsel %vm569_vm6, %v568_v11, %v563_v53  ;;  %vm900_vm6 = vcmask 31744  }
  0xba   : > { %v450_v46 = vmul.f32 0.015625, %v1931_v19  ;;  %v577_v61 = vsel %vm576_vm7, %v575_v54, %v570_v38 }
  0xbb   : > { %v678_v23 = vrot.slane %v466_v7, %v1959_v26 }
  0xbc   : > { %v1935_v30 = vpop.xlane.xlu1 %420  ;;  %v582_v47 = vrot.slane %v450_v46, %v1959_v26 }
  0xbd   : > { %v1937_v31 = vpop.xlane.xlu0 %372  ;;  %v467_v18 = vmul.f32 0.015625, %v1935_v30 }
  0xbe   : > { %v451_v19 = vmul.f32 0.015625, %v1937_v31  ;;  %v674_v31 = vsel %vm576_vm7, %v673_v52, %v669_v34  ;;  %v584_v20 = vsel %vm583_vm8, %v582_v47, %v577_v61 }
  0xbf   : > { %v679_v6 = vsel %vm583_vm8, %v678_v23, %v674_v31  ;;  %v1404_v31 = vld [vmem:[%s2197_s6] ss:$0 sm:$0xff] }
  0xc0   : > { %v1945_v15 = vpop.xlane.xlu1 %423 }
  0xc1   : > { %v1947_v55 = vpop.xlane.xlu0 %375  ;;  %v468_v39 = vmul.f32 0.015625, %v1945_v15  ;;  %v683_v15 = vrot.slane %v467_v18, %v1962_v27 }
  0xc2   : > { %v452_v60 = vmul.f32 0.015625, %v1947_v55  ;;  %v589_v55 = vrot.slane %v451_v19, %v1962_v27 }
  0xc3   : > { %v688_v26 = vrot.slane %v468_v39, %v1965_v48 }
  0xc4   : > { %v427_v24 = vpop.xlane.xlu1 %426  ;;  %v591_v12 = vsel %vm590_vm9, %v589_v55, %v584_v20  ;;  %v981_v20 = vld [vmem:[%s2194_s3 + $0x10] sm:$0xff] }
  0xc5   : > { %v379_v42 = vpop.xlane.xlu0 %378  ;;  %v469_v50 = vmul.f32 0.015625, %v427_v24  ;;  %v596_v24 = vrot.slane %v452_v60, %v1965_v48  ;;  %v684_v48 = vsel %vm590_vm9, %v683_v15, %v679_v6  ;;  %v982_v6 = vld [vmem:[%s2194_s3 + $0x18] sm:$0xff] }
  0xc6   : > { %v453_v57 = vmul.f32 0.015625, %v379_v42  ;;  %v689_v46 = vsel %vm597_vm10, %v688_v26, %v684_v48 }
  0xc8   : > { %v430_v3 = vpop.xlane.xlu1 %429 }
  0xc9   : > { %v382_v37 = vpop.xlane.xlu0 %381  ;;  %v470_v62 = vmul.f32 0.015625, %v430_v3  ;;  %v693_v3 = vrot.slane %v469_v50, %v1968_v35 }
  0xca   : > { %v454_v2 = vmul.f32 0.015625, %v382_v37  ;;  %v603_v37 = vrot.slane %v453_v57, %v1968_v35  ;;  %v598_v35 = vsel %vm597_vm10, %v596_v24, %v591_v12 }
  0xcb   : > { %v698_v27 = vrot.slane %v470_v62, %v1971_v40 }
  0xcc   : > { %v433_v56 = vpop.xlane.xlu1 %432  ;;  %v610_v16 = vrot.slane %v454_v2, %v1971_v40  ;;  %v694_v40 = vsel %vm604_vm11, %v693_v3, %v689_v46  ;;  %v605_v0 = vsel %vm604_vm11, %v603_v37, %v598_v35 }
  0xcd   : > { %v385_v51 = vpop.xlane.xlu0 %384  ;;  %v471_v63 = vmul.f32 0.015625, %v433_v56 }
  0xce   : > { %v455_v44 = vmul.f32 0.015625, %v385_v51  ;;  %v612_v53 = vsel %vm611_vm12, %v610_v16, %v605_v0  ;;  %v979_v16 = vld [vmem:[%s2194_s3] sm:$0xff] }
  0xcf   : > { %v703_v14 = vrot.slane %v471_v63, %v1974_v43 }
  0xd0   : > { %v436_v30 = vpop.xlane.xlu1 %435  ;;  %v617_v7 = vrot.slane %v455_v44, %v1974_v43  ;;  %v699_v43 = vsel %vm611_vm12, %v698_v27, %v694_v40  ;;  %v980_v27 = vld [vmem:[%s2194_s3 + $0x8] sm:$0xff] }
  0xd1   : > { %v388_v58 = vpop.xlane.xlu0 %387  ;;  %v472_v42 = vmul.f32 0.015625, %v436_v30  ;;  %v704_v34 = vsel %vm618_vm13, %v703_v14, %v699_v43 }
  0xd2   : > { %v456_v4 = vmul.f32 0.015625, %v388_v58  ;;  %v2236_v58 = vmov 0.0  }
  0xd3   : > { %v708_v56 = vrot.slane %v472_v42, %v1977_v59 }
  0xd4   : > { %v439_v36 = vpop.xlane.xlu1 %438  ;;  %v624_v51 = vrot.slane %v456_v4, %v1977_v59  ;;  %v619_v59 = vsel %vm618_vm13, %v617_v7, %v612_v53  ;;  %v899_v4 = vld [vmem:[%s2198_s7] sm:$0xf]  ;;  %v1206_v53 = vsub.s32 1, %v1933_v22 }
  0xd5   : > { %v391_v32 = vpop.xlane.xlu0 %390  ;;  %v473_v8 = vmul.f32 0.015625, %v439_v36  ;;  %v709_v38 = vsel %vm625_vm14, %v708_v56, %v704_v34 }
  0xd6   : > { %v457_v11 = vmul.f32 0.015625, %v391_v32  ;;  %v626_v39 = vsel %vm625_vm14, %v624_v51, %v619_v59  ;;  %v983_v32 = vld [vmem:[%s2195_s4] sm:$0xf] }
  0xd7   : > { %v713_v45 = vrot.slane %v473_v8, %v1986_v10  ;;  %v1405_v8 = vld [vmem:[%s2193_s2] ss:$0 sm:$0xff] }
  0xd8   : > { %v631_v52 = vrot.slane %v457_v11, %v1986_v10  ;;  %v442_v54 = vpop.xlane.xlu1 %441 }
  0xd9   : > { %v394_v49 = vpop.xlane.xlu0 %393  ;;  %v474_v18 = vmul.f32 0.015625, %v442_v54  ;;  %v714_v47 = vsel %vm632_vm15, %v713_v45, %v709_v38  ;;  %v1139_v54 = vsub.s32 0, %v1933_v22 }
  0xda   : > { %v458_v19 = vmul.f32 0.015625, %v394_v49  ;;  %v633_v23 = vsel %vm632_vm15, %v631_v52, %v626_v39 }
  0xdb   : > { %v718_v10 = vrot.slane %v474_v18, %v1989_v28 }
  0xdc   : > { %v638_v60 = vrot.slane %v458_v19, %v1989_v28 }
  0xdd   : > { %v719_v57 = vsel %vm639_vm2, %v718_v10, %v714_v47 }
  0xde   : > { %v640_v50 = vsel %vm639_vm2, %v638_v60, %v633_v23 }
  0xdf   : > { %v721_v30 = vsel %vm720_vm3, %v719_v57, %v640_v50 }
  0xe0   : > { %1492 = vmatmul.mubr.f32.vlgmr.msra.gmra.mxu0 %v721_v30  ;;  %1527 = vmatmul.mubr.f32.vlgmr.msra.gmra.mxu1 %v721_v30 }
  0xe1   : > { %1531 = vmatprep.mubr.msk.f32.mxu1 %vm1582_vm1, %v2236_v58  ;;  %1547 = vmatprep.mubr.msk.f32.mxu0 %vm1582_vm1, %v2236_v58 }
  0xe2   : > { %1530 = vmatpush3.msk.msra.mxu1 %vm904_vm5, %v899_v4  ;;  %1540 = vmatpush3.msra.mxu0 %v982_v6  ;;  %v1568_v4 = vld [vmem:[%s1644_s11 + $0x80] sm:$0xff] }
  0xe3   : > { %1534 = vmatprep.subr.mxu1 %v2236_v58  ;;  %1541 = vmatprep.subr.mxu0 %v2236_v58 }
  0xe4   : > { %1542 = vmatpush3.msra.mxu0 %v981_v20 }
  0xe5   : > { %1543 = vmatprep.subr.mxu0 %v2236_v58 }
  0xe6   : > { %1544 = vmatpush3.msra.mxu0 %v980_v27 }
  0xe7   : > { %1545 = vmatprep.subr.mxu0 %v2236_v58 }
  0xe8   : > { %1546 = vmatpush3.msra.mxu0 %v979_v16 }
 0x1a0   : > { %v789_v28 = vpop.f32.mrf.mxu0  ;;  %v894_v61 = vpop.f32.mrf.mxu1 }
 0x1a1   : > { %v790_v62 = vadd.f32 %v1404_v31, %v789_v28  ;;  %v895_v11 = vadd.f32 %v1405_v8, %v894_v61  ;;  %v2238_v61 = vld [vmem:[#allocation12_spill] sm:$0xff] }
 0x1a2   : > { %v1493_v2 = vpop.f32.mrf.mxu0  ;;  %v1528_v15 = vpop.f32.mrf.mxu1 }
 0x1a3   : > { %v794_v55 = vsel %vm793_vm4, %v790_v62, -inf  ;;  %v898_v48 = vmax.f32 %v895_v11, 0.0  ;;  %v2239_v2 = vld [vmem:[#allocation10_spill] sm:$0xff]  ;;  %v1570_v11 = vld [vmem:[%s1644_s11 + $0x88] sm:$0xff] }
 0x1a4   : > { %795 = vmax.xlane.f32.xlu0 %v794_v55  ;;  %v2240_v55 = vld [vmem:[#allocation16_spill] sm:$0xff] }
 0x22d   : > { %v796_v63 = vpop.xlane.xlu0 %795 }
 0x22e   : > { %v797_v44 = vsub.f32 %v790_v62, %v796_v63 }
 0x230   : > { %v798_v26 = vmul.f32 1.442695, %v797_v44 }
 0x232   : > { %1560 = vpow2.f32 %v798_v26 }
 0x23f   : > { %v1561_v24 = vpop.eup %1560 }
 0x240   : > { %v800_v42 = vsel %vm793_vm4, %v1561_v24, 0.0 }
 0x241   : > { %801 = vadd.xlane.f32.xlu1 %v800_v42 }
 0x2ca   : > { %v802_v3 = vpop.xlane.xlu1 %801 }
 0x2cb   : > { %1562 = vrcp.f32 %v802_v3 }
 0x2d8   : > { %v1563_v37 = vpop.eup %1562 }
 0x2d9   : > { %v804_v36 = vmul.f32 %v1563_v37, %v1561_v24  ;;  %v2241_v24 = vld [vmem:[#allocation14_spill] sm:$0xff] }
 0x2da   : > { %v2242_v37 = vld [vmem:[#allocation18_spill] sm:$0xff] }
 0x2db   : > { %1532 = vmatmul.mubr.msk.f32.vlgmr.msra.gmra.mxu1 %vm900_vm6, %v804_v36 }
 0x2dc   : > { %1535 = vmatpush3.msk.msra.mxu1 %vm904_vm5, %v983_v32  ;;  %1536 = vmatprep.mubr.msk.f32.mxu1 %vm1582_vm1, %v2236_v58  ;;  %vm1057_vm1 = vcmask 261120   ;;  %v1569_v32 = vld [vmem:[%s1644_s11 + $0x90] sm:$0xff] }
 0x2df   : > { %1537 = vmatmul.mubr.msk.f32.vlgmr.msra.gmra.mxu1 %vm900_vm6, %v804_v36 }
 0x39b   : > { %v974_v12 = vpop.f32.mrf.mxu1 }
 0x39c   : > { %v978_v14 = vmul.f32 %v974_v12, %v898_v48  ;;  %v2243_v12 = vld [vmem:[#allocation2_spill] sm:$0xff] }
 0x39d   : > { %v1533_v7 = vpop.f32.mrf.mxu1 }
 0x39e   : > { %1548 = vmatmul.mubr.msk.f32.vlgmr.msra.gmra.mxu0 %vm1057_vm1, %v978_v14 }
 0x39f   : > { %v1053_v46 = vpop.f32.mrf.mxu1 }
 0x3a1   : > { %v1538_v35 = vpop.f32.mrf.mxu1 }
 0x3a2   : > { %v1571_v35 = vld [vmem:[%s1644_s11 + $0x98] sm:$0xff] }
 0x45e   : > { %v1127_v56 = vpop.f32.mrf.mxu0 }
 0x45f   : > { %v1128_v51 = vadd.f32 %v1127_v56, %v1053_v46 }
 0x460   : > { %v1549_v40 = vpop.f32.mrf.mxu0 }
 0x461   : > { %v1411_v0 = vmul.f32 -1.442695, %v1128_v51  ;;  %v2244_v51 = vld [vmem:[#allocation3_spill] sm:$0xff] }
 0x463   : > { %1564 = vpow2.f32 %v1411_v0 }
 0x470   : > { %v1565_v45 = vpop.eup %1564 }
 0x471   : > { %v1134_v52 = vadd.f32 1.0, %v1565_v45 }
 0x473   : > { %1566 = vrcp.f32 %v1134_v52  ;;  %v1572_v52 = vld [vmem:[%s1644_s11 + $0xa8] sm:$0xff] }
 0x480   : > { %v1567_v49 = vpop.eup %1566 }
 0x481   : > { %v1140_v43 = vrot.slane %v1567_v49, %v1139_v54  ;;  %v1207_v18 = vrot.slane %v1567_v49, %v1206_v53  ;;  %v2245_v49 = vld [vmem:[#allocation5_spill] sm:$0xff] }
 0x483   : > { %1146 = vbcast.lane.b32.xlu1 %v1140_v43, 264  ;;  %1142 = vbcast.lane.b32.xlu0 %v1140_v43, 256 }
 0x487   : > { %1150 = vbcast.lane.b32.xlu1 %v1140_v43, 272  ;;  %1158 = vbcast.lane.b32.xlu0 %v1140_v43, 288 }
 0x48b   : > { %1154 = vbcast.lane.b32.xlu1 %v1140_v43, 280  ;;  %1166 = vbcast.lane.b32.xlu0 %v1140_v43, 304 }
 0x48f   : > { %1162 = vbcast.lane.b32.xlu1 %v1140_v43, 296  ;;  %1174 = vbcast.lane.b32.xlu0 %v1140_v43, 320 }
 0x493   : > { %1170 = vbcast.lane.b32.xlu1 %v1140_v43, 312  ;;  %1182 = vbcast.lane.b32.xlu0 %v1140_v43, 336 }
 0x497   : > { %1178 = vbcast.lane.b32.xlu1 %v1140_v43, 328  ;;  %1190 = vbcast.lane.b32.xlu0 %v1140_v43, 352 }
 0x49b   : > { %1186 = vbcast.lane.b32.xlu1 %v1140_v43, 344  ;;  %1198 = vbcast.lane.b32.xlu0 %v1140_v43, 368 }
 0x49f   : > { %1194 = vbcast.lane.b32.xlu1 %v1140_v43, 360  ;;  %1209 = vbcast.lane.b32.xlu0 %v1207_v18, 256 }
 0x4a3   : > { %1202 = vbcast.lane.b32.xlu1 %v1140_v43, 376  ;;  %1217 = vbcast.lane.b32.xlu0 %v1207_v18, 272 }
 0x4a7   : > { %1213 = vbcast.lane.b32.xlu1 %v1207_v18, 264  ;;  %1225 = vbcast.lane.b32.xlu0 %v1207_v18, 288 }
 0x4ab   : > { %1221 = vbcast.lane.b32.xlu1 %v1207_v18, 280  ;;  %1233 = vbcast.lane.b32.xlu0 %v1207_v18, 304 }
 0x4af   : > { %1229 = vbcast.lane.b32.xlu1 %v1207_v18, 296  ;;  %1241 = vbcast.lane.b32.xlu0 %v1207_v18, 320 }
 0x4b3   : > { %1237 = vbcast.lane.b32.xlu1 %v1207_v18, 312  ;;  %1249 = vbcast.lane.b32.xlu0 %v1207_v18, 336 }
 0x4b7   : > { %1245 = vbcast.lane.b32.xlu1 %v1207_v18, 328  ;;  %1257 = vbcast.lane.b32.xlu0 %v1207_v18, 352 }
 0x4bb   : > { %1253 = vbcast.lane.b32.xlu1 %v1207_v18, 344  ;;  %1265 = vbcast.lane.b32.xlu0 %v1207_v18, 368 }
 0x4bf   : > { %1261 = vbcast.lane.b32.xlu1 %v1207_v18, 360 }
 0x4c3   : > { %1269 = vbcast.lane.b32.xlu1 %v1207_v18, 376 }
 0x4f5   : > { %v1147_v22 = vpop.permute.xlu1 %1146  ;;  %v1143_v19 = vpop.permute.xlu0 %1142 }
 0x4f6   : > { %v1272_v34 = vmul.f32 %v1147_v22, %v1655_v5  ;;  %v1271_v59 = vmul.f32 %v1143_v19, %v1648_v1  ;;  %v2246_v22 = vld [vmem:[#allocation4_spill] sm:$0xff] }
 0x4f8   : > { %1304 = vst.msk [vmem:[%s2090_s22 + $0x8] sm:$0xff] %vm346_vm0, %v1272_v34  ;;  %1303 = vst.msk [vmem:[%s2090_s22] sm:$0xff] %vm346_vm0, %v1271_v59  ;;  %v2247_v34 = vld [vmem:[#allocation8_spill] sm:$0xff] }
 0x4f9   : > { %v1151_v38 = vpop.permute.xlu1 %1150  ;;  %v1159_v39 = vpop.permute.xlu0 %1158 }
 0x4fa   : > { %v1273_v10 = vmul.f32 %v1151_v38, %v1662_v9  ;;  %v1275_v60 = vmul.f32 %v1159_v39, %v1678_v17 }
 0x4fc   : > { %1305 = vst.msk [vmem:[%s2090_s22 + $0x10] sm:$0xff] %vm346_vm0, %v1273_v10  ;;  %1307 = vst.msk [vmem:[%s2090_s22 + $0x20] sm:$0xff] %vm346_vm0, %v1275_v60  ;;  %v2248_v10 = vld [vmem:[#allocation6_spill] sm:$0xff] }
 0x4fd   : > { %v1155_v23 = vpop.permute.xlu1 %1154  ;;  %v1167_v5 = vpop.permute.xlu0 %1166 }
 0x4fe   : > { %v1274_v1 = vmul.f32 %v1155_v23, %v1669_v13  ;;  %v1277_v47 = vmul.f32 %v1167_v5, %v1695_v25  ;;  %v2249_v23 = vld [vmem:[#allocation11_spill] sm:$0xff] }
 0x500   : > { %1306 = vst.msk [vmem:[%s2090_s22 + $0x18] sm:$0xff] %vm346_vm0, %v1274_v1  ;;  %1309 = vst.msk [vmem:[%s2090_s22 + $0x30] sm:$0xff] %vm346_vm0, %v1277_v47 }
 0x501   : > { %v1163_v50 = vpop.permute.xlu1 %1162  ;;  %v1175_v9 = vpop.permute.xlu0 %1174 }
 0x502   : > { %v1276_v17 = vmul.f32 %v1163_v50, %v1686_v21  ;;  %v1279_v57 = vmul.f32 %v1175_v9, %v1715_v33  ;;  %v2237_v33 = vld [vmem:[#allocation7_spill] sm:$0xff]  ;;  %v2250_v50 = vld [vmem:[#allocation9_spill] sm:$0xff] }
 0x504   : > { %1308 = vst.msk [vmem:[%s2090_s22 + $0x28] sm:$0xff] %vm346_vm0, %v1276_v17  ;;  %1311 = vst.msk [vmem:[%s2090_s22 + $0x40] sm:$0xff] %vm346_vm0, %v1279_v57  ;;  %v2251_v17 = vld [vmem:[#allocation15_spill] sm:$0xff] }
 0x505   : > { %v1171_v30 = vpop.permute.xlu1 %1170  ;;  %v1183_v13 = vpop.permute.xlu0 %1182 }
 0x506   : > { %v1278_v25 = vmul.f32 %v1171_v30, %v1705_v29  ;;  %v1281_v58 = vmul.f32 %v1183_v13, %v1735_v41  ;;  %v2252_v13 = vld [vmem:[#allocation13_spill] sm:$0xff] }
 0x508   : > { %1310 = vst.msk [vmem:[%s2090_s22 + $0x38] sm:$0xff] %vm346_vm0, %v1278_v25  ;;  %1313 = vst.msk [vmem:[%s2090_s22 + $0x50] sm:$0xff] %vm346_vm0, %v1281_v58 }
 0x509   : > { %v1179_v21 = vpop.permute.xlu1 %1178  ;;  %v1191_v31 = vpop.permute.xlu0 %1190 }
 0x50a   : > { %v1280_v28 = vmul.f32 %v1179_v21, %v2237_v33  ;;  %v1283_v62 = vmul.f32 %v1191_v31, %v2238_v61  ;;  %v2253_v21 = vld [vmem:[#allocation17_spill] sm:$0xff] }
 0x50c   : > { %1312 = vst.msk [vmem:[%s2090_s22 + $0x48] sm:$0xff] %vm346_vm0, %v1280_v28  ;;  %1315 = vst.msk [vmem:[%s2090_s22 + $0x60] sm:$0xff] %vm346_vm0, %v1283_v62 }
 0x50d   : > { %v1187_v29 = vpop.permute.xlu1 %1186  ;;  %v1199_v41 = vpop.permute.xlu0 %1198 }
 0x50e   : > { %v1282_v15 = vmul.f32 %v1187_v29, %v2239_v2  ;;  %v1285_v63 = vmul.f32 %v1199_v41, %v2240_v55 }
 0x510   : > { %1314 = vst.msk [vmem:[%s2090_s22 + $0x58] sm:$0xff] %vm346_vm0, %v1282_v15  ;;  %1317 = vst.msk [vmem:[%s2090_s22 + $0x70] sm:$0xff] %vm346_vm0, %v1285_v63 }
 0x511   : > { %v1195_v44 = vpop.permute.xlu1 %1194  ;;  %v1210_v26 = vpop.permute.xlu0 %1209 }
 0x512   : > { %v1284_v42 = vmul.f32 %v1195_v44, %v2241_v24  ;;  %v1287_v6 = vmul.f32 %v1568_v4, %v1210_v26 }
 0x514   : > { %1316 = vst.msk [vmem:[%s2090_s22 + $0x68] sm:$0xff] %vm346_vm0, %v1284_v42  ;;  %1319 = vst.msk [vmem:[%s2090_s22 + $0x80] sm:$0xff] %vm346_vm0, %v1287_v6 }
 0x515   : > { %v1203_v20 = vpop.permute.xlu1 %1202  ;;  %v1218_v3 = vpop.permute.xlu0 %1217 }
 0x516   : > { %v1286_v36 = vmul.f32 %v1203_v20, %v2242_v37  ;;  %v1289_v27 = vmul.f32 %v1569_v32, %v1218_v3 }
 0x518   : > { %1318 = vst.msk [vmem:[%s2090_s22 + $0x78] sm:$0xff] %vm346_vm0, %v1286_v36  ;;  %1321 = vst.msk [vmem:[%s2090_s22 + $0x90] sm:$0xff] %vm346_vm0, %v1289_v27 }
 0x519   : > { %v1214_v16 = vpop.permute.xlu1 %1213  ;;  %v1226_v8 = vpop.permute.xlu0 %1225 }
 0x51a   : > { %v1288_v48 = vmul.f32 %v1570_v11, %v1214_v16  ;;  %v1291_v14 = vmul.f32 %v1226_v8, %v2243_v12 }
 0x51c   : > { %1320 = vst.msk [vmem:[%s2090_s22 + $0x88] sm:$0xff] %vm346_vm0, %v1288_v48  ;;  %1323 = vst.msk [vmem:[%s2090_s22 + $0xa0] sm:$0xff] %vm346_vm0, %v1291_v14 }
 0x51d   : > { %v1222_v7 = vpop.permute.xlu1 %1221  ;;  %v1234_v46 = vpop.permute.xlu0 %1233 }
 0x51e   : > { %v1290_v56 = vmul.f32 %v1571_v35, %v1222_v7  ;;  %v1293_v40 = vmul.f32 %v1234_v46, %v2244_v51 }
 0x520   : > { %1322 = vst.msk [vmem:[%s2090_s22 + $0x98] sm:$0xff] %vm346_vm0, %v1290_v56  ;;  %1325 = vst.msk [vmem:[%s2090_s22 + $0xb0] sm:$0xff] %vm346_vm0, %v1293_v40 }
 0x521   : > { %v1230_v0 = vpop.permute.xlu1 %1229  ;;  %v1242_v45 = vpop.permute.xlu0 %1241 }
 0x522   : > { %v1292_v54 = vmul.f32 %v1572_v52, %v1230_v0  ;;  %v1295_v43 = vmul.f32 %v1242_v45, %v2245_v49 }
 0x524   : > { %1324 = vst.msk [vmem:[%s2090_s22 + $0xa8] sm:$0xff] %vm346_vm0, %v1292_v54  ;;  %1327 = vst.msk [vmem:[%s2090_s22 + $0xc0] sm:$0xff] %vm346_vm0, %v1295_v43 }
 0x525   : > { %v1238_v53 = vpop.permute.xlu1 %1237  ;;  %v1250_v18 = vpop.permute.xlu0 %1249 }
 0x526   : > { %v1294_v19 = vmul.f32 %v1238_v53, %v2246_v22  ;;  %v1297_v59 = vmul.f32 %v1250_v18, %v2247_v34 }
 0x528   : > { %1326 = vst.msk [vmem:[%s2090_s22 + $0xb8] sm:$0xff] %vm346_vm0, %v1294_v19  ;;  %1329 = vst.msk [vmem:[%s2090_s22 + $0xd0] sm:$0xff] %vm346_vm0, %v1297_v59 }
 0x529   : > { %v1246_v38 = vpop.permute.xlu1 %1245  ;;  %v1258_v39 = vpop.permute.xlu0 %1257 }
 0x52a   : > { %v1296_v60 = vmul.f32 %v1246_v38, %v2248_v10  ;;  %v1299_v5 = vmul.f32 %v1258_v39, %v2249_v23 }
 0x52c   : > { %1328 = vst.msk [vmem:[%s2090_s22 + $0xc8] sm:$0xff] %vm346_vm0, %v1296_v60  ;;  %1331 = vst.msk [vmem:[%s2090_s22 + $0xe0] sm:$0xff] %vm346_vm0, %v1299_v5 }
 0x52d   : > { %v1254_v1 = vpop.permute.xlu1 %1253  ;;  %v1266_v47 = vpop.permute.xlu0 %1265 }
 0x52e   : > { %v1298_v9 = vmul.f32 %v1254_v1, %v2250_v50  ;;  %v1301_v57 = vmul.f32 %v1266_v47, %v2251_v17 }
 0x530   : > { %1330 = vst.msk [vmem:[%s2090_s22 + $0xd8] sm:$0xff] %vm346_vm0, %v1298_v9  ;;  %1333 = vst.msk [vmem:[%s2090_s22 + $0xf0] sm:$0xff] %vm346_vm0, %v1301_v57 }
 0x531   : > { %v1262_v30 = vpop.permute.xlu1 %1261 }
 0x532   : > { %v1300_v25 = vmul.f32 %v1262_v30, %v2252_v13 }
 0x534   : > { %1332 = vst.msk [vmem:[%s2090_s22 + $0xe8] sm:$0xff] %vm346_vm0, %v1300_v25 }
 0x535   : > { %v1270_v58 = vpop.permute.xlu1 %1269 }
 0x536   : > { %v1302_v31 = vmul.f32 %v1270_v58, %v2253_v21 }
 0x538   : > { %1334 = vst.msk [vmem:[%s2090_s22 + $0xf8] sm:$0xff] %vm346_vm0, %v1302_v31 }
 0x539 PF: > { %s18_s27 = sadd.s32 1, %s1579_s27  }
 0x53a   : > { %p15_p4 = scmp.ge.s32.totalorder %s18_s27, 4  }
 0x53c   :  { %17 = sbr.rel (!%p15_p4) target bundleno = 1 (0x1), region = 82 }

</bundles_post_ra>
